<compile_context>
chip_gen: v7x
topology: tpu7x:2x2x1
jax: 0.10.0
libtpu: 0.0.40
codegen_flags: <defaults>
</compile_context>

<pallas_src>
import jax
import jax.numpy as jnp
from jax.experimental import pallas as pl
from jax.experimental.pallas import tpu as pltpu

NEG_SLOPE = 0.01  # torch.nn.LeakyReLU default negative slope


def _leaky(h):
    # max(h, 0.01*h) == LeakyReLU(0.01)(h); one mul + one max.
    return jnp.maximum(h, NEG_SLOPE * h)


def _mlp_kernel(x_ref, w1t_ref, b1t_ref, w2t_ref, b2t_ref, w3t_ref, b3_ref, o_ref):
    """One batch tile (batch on lanes) of the 3-layer MLP; weights VMEM-resident.

    Tail-tile lanes beyond the true batch extent hold undefined data (inputs are
    not padded).  That is safe only because every lane (= batch row) is computed
    independently — do NOT add any cross-lane reduction to this kernel.
    """
    x = x_ref[...]                                            # (S+1, TB)

    # Layer 1 (the concat is already fused: action is the last sublane row of x).
    h1 = jnp.dot(w1t_ref[...], x, preferred_element_type=jnp.float32)
    h1 = _leaky(h1 + b1t_ref[...])                            # (F1, TB)

    # Layer 2
    h2 = jnp.dot(w2t_ref[...], h1, preferred_element_type=jnp.float32)
    h2 = _leaky(h2 + b2t_ref[...])                            # (F2, TB)

    # Layer 3: (1, F2) @ (F2, TB) -> (1, TB), lane-dense store.
    out = jnp.dot(w3t_ref[...], h2, preferred_element_type=jnp.float32)
    o_ref[...] = (out + b3_ref[0, 0]).astype(o_ref.dtype)


def _round_up(x, m):
    return (x + m - 1) // m * m


def state_action_value_forward(state, action, params, *, tile_b=8192):
    """Replicates StateActionValueNetwork.forward(state, action) -> (B, 1)."""
    state = jnp.asarray(state, jnp.float32)
    action = jnp.asarray(action, jnp.float32)
    if action.ndim == 1:
        action = action[None]

    B, S = state.shape
    action_row = action.reshape(1, B)            # same element order as torch reshape((-1,1))

    w1, b1 = params["w1"], params["b1"]
    w2, b2 = params["w2"], params["b2"]
    w3, b3 = params["w3"], params["b3"]
    F1, F2 = w1.shape[1], w2.shape[1]
    S1 = S + 1

    # Batch-on-lanes slab: (S+1, B) with the action fused in as the last sublane
    # row — folds the concat into the layer-1 matmul and keeps every VMEM tile
    # lane-dense.  (If the producer can emit (S, B) layout directly, this
    # wrapper transpose disappears entirely.)
    x_t = jnp.concatenate([state.T, action_row], axis=0)      # (S+1, B)

    # Transposed weights / biases (tiny, one-time).
    w1t = w1.T                       # (F1, S+1)
    b1t = b1.reshape(F1, 1)
    w2t = w2.T                       # (F2, F1)
    b2t = b2.reshape(F2, 1)
    w3t = w3.reshape(1, F2)          # (F2, 1) -> (1, F2), free
    b3s = b3.reshape(1, 1)           # scalar -> SMEM

    # Tile sizing: lane-dense multiples of 128.  With the transposed layout an
    # input tile is only (S+1)*tile_b*4 bytes; the f32 intermediates
    # (~F2*tile_b*4 ~= 3.3 MiB at tile_b=8192) dominate VMEM, comfortably under
    # the 32 MiB limit below on all generations.  Cap at ceil(B/2) tiles so the
    # "parallel" grid axis has >= 2 steps and both v7x TensorCores get work.
    tile_b = max(128, min(int(tile_b), _round_up(B, 128)))
    if B > 256:
        tile_b = min(tile_b, _round_up(pl.cdiv(B, 2), 128))
    grid = pl.cdiv(B, tile_b)        # no input padding; tail block is partial

    out_t = pl.pallas_call(
        _mlp_kernel,
        out_shape=jax.ShapeDtypeStruct((1, B), jnp.float32),
        grid=(grid,),
        in_specs=[
            pl.BlockSpec((S1, tile_b), lambda i: (0, i)),        # x slab tile
            pl.BlockSpec((F1, S1), lambda i: (0, 0)),            # W1^T (resident)
            pl.BlockSpec((F1, 1), lambda i: (0, 0)),             # b1
            pl.BlockSpec((F2, F1), lambda i: (0, 0)),            # W2^T (resident)
            pl.BlockSpec((F2, 1), lambda i: (0, 0)),             # b2
            pl.BlockSpec((1, F2), lambda i: (0, 0)),             # W3^T
            pl.BlockSpec(memory_space=pltpu.MemorySpace.SMEM),   # b3 scalar
        ],
        out_specs=pl.BlockSpec((1, tile_b), lambda i: (0, i)),
        compiler_params=pltpu.CompilerParams(
            dimension_semantics=("parallel",),
            vmem_limit_bytes=32 * 1024 * 1024),
    )(x_t, w1t, b1t, w2t, b2t, w3t, b3s)

    # (1, B) -> (B, 1) is a free reshape (same element order).
    return out_t.reshape(B, 1)


def init_params(key, state_size, action_size,
                fc1_units=20, fc2_units=100, fc3_units=100):
    """PyTorch-Linear-style init; weights stored (in, out), biases (1, out)."""
    # The module builds nn.Linear(fc3_units, 1) on top of an fc2_units-wide
    # activation; it only works because fc2_units == fc3_units.
    assert fc2_units == fc3_units, "module wires Linear(fc3_units, 1) onto fc2 output"
    mlp_in = state_size + action_size
    ks = jax.random.split(key, 6)

    def lin(kw, kb, fan_in, fan_out):
        bound = 1.0 / jnp.sqrt(jnp.float32(fan_in))
        w = jax.random.uniform(kw, (fan_in, fan_out), jnp.float32, -bound, bound)
        b = jax.random.uniform(kb, (1, fan_out), jnp.float32, -bound, bound)
        return w, b

    w1, b1 = lin(ks[0], ks[1], mlp_in, fc1_units)
    w2, b2 = lin(ks[2], ks[3], fc1_units, fc2_units)
    w3, b3 = lin(ks[4], ks[5], fc2_units, 1)
    return {"w1": w1, "b1": b1, "w2": w2, "b2": b2, "w3": w3, "b3": b3}


def _reference(state, action, params):
    """Pure-JAX reference (highest precision) for correctness check."""
    if action.ndim == 1:
        action = action[None]
    x = jnp.concatenate(
        [state, action.reshape((-1, 1)).astype(state.dtype)], axis=-1)
    hp = jax.lax.Precision.HIGHEST

    def leaky(v):
        return jnp.where(v > 0, v, NEG_SLOPE * v)

    h1 = leaky(jnp.dot(x, params["w1"], precision=hp) + params["b1"])
    h2 = leaky(jnp.dot(h1, params["w2"], precision=hp) + params["b2"])
    return jnp.dot(h2, params["w3"], precision=hp) + params["b3"]


if __name__ == "__main__":
    key = jax.random.PRNGKey(0)
    k_p, k_s1, k_a1, k_s2, k_a2 = jax.random.split(key, 5)

    state_size, action_size = 7, 1
    params = init_params(k_p, state_size, action_size)

    fwd = jax.jit(state_action_value_forward, static_argnames=("tile_b",))

    # Small batch, 1-D action path (single partial 128-lane tile, grid=1).
    state = jax.random.normal(k_s1, (8, state_size), jnp.float32)
    action = jax.random.normal(k_a1, (8,), jnp.float32)
    out = jax.block_until_ready(fwd(state, action, params))
    ref = _reference(state, action, params)
    assert out.shape == (8, 1), out.shape
    assert jnp.allclose(out, ref, atol=1e-4, rtol=1e-4), (out, ref)

    # Multi-tile grid + ragged tail (300 rows, tile_b=128 -> 3 tiles, last partial).
    state2 = jax.random.normal(k_s2, (300, state_size), jnp.float32)
    action2 = jax.random.normal(k_a2, (300, 1), jnp.float32)
    out2 = jax.block_until_ready(fwd(state2, action2, params, tile_b=128))
    ref2 = _reference(state2, action2, params)
    assert out2.shape == (300, 1), out2.shape
    assert jnp.allclose(out2, ref2, atol=1e-4, rtol=1e-4), (out2, ref2)

    print("KERNEL_OK")
</pallas_src>

<mosaic_0001>
module attributes {stable_mosaic.version = 11 : i64} {
  func.func @_mlp_kernel(%arg0: i32, %arg1: memref<8x128xf32, #tpu.memory_space<vmem>>, %arg2: memref<20x8xf32, #tpu.memory_space<vmem>>, %arg3: memref<20x1xf32, #tpu.memory_space<vmem>>, %arg4: memref<100x20xf32, #tpu.memory_space<vmem>>, %arg5: memref<100x1xf32, #tpu.memory_space<vmem>>, %arg6: memref<1x100xf32, #tpu.memory_space<vmem>>, %arg7: memref<1x1xf32, #tpu.memory_space<smem>>, %arg8: memref<1x128xf32, #tpu.memory_space<vmem>>) attributes {dimension_semantics = [#tpu.dimension_semantics<parallel>], iteration_bounds = array<i64: 1>, scalar_prefetch = 0 : i64, scratch_operands = 0 : i64, tpu.core_type = #tpu.core_type<tc>, window_params = [{transform_indices = @transform_0, window_bounds = array<i64: 8, 128>}, {pipeline_mode = #tpu.pipeline_mode<synchronous>, transform_indices = @transform_1, window_bounds = array<i64: 20, 8>}, {pipeline_mode = #tpu.pipeline_mode<synchronous>, transform_indices = @transform_2, window_bounds = array<i64: 20, 1>}, {pipeline_mode = #tpu.pipeline_mode<synchronous>, transform_indices = @transform_3, window_bounds = array<i64: 100, 20>}, {pipeline_mode = #tpu.pipeline_mode<synchronous>, transform_indices = @transform_4, window_bounds = array<i64: 100, 1>}, {pipeline_mode = #tpu.pipeline_mode<synchronous>, transform_indices = @transform_5, window_bounds = array<i64: 1, 100>}, {transform_indices = @transform_6, window_bounds = array<i64: 1, 1>}, {transform_indices = @transform_7, window_bounds = array<i64: 1, 128>}]} {
    %c0 = arith.constant 0 : index
    %c0_0 = arith.constant 0 : index
    %0 = vector.load %arg1[%c0, %c0_0] : memref<8x128xf32, #tpu.memory_space<vmem>>, vector<8x128xf32>
    %c0_1 = arith.constant 0 : index
    %c0_2 = arith.constant 0 : index
    %1 = vector.load %arg2[%c0_1, %c0_2] : memref<20x8xf32, #tpu.memory_space<vmem>>, vector<20x8xf32>
    %cst = arith.constant dense<0.000000e+00> : vector<20x128xf32>
    %2 = tpu.matmul %1, %0, %cst {dimension_numbers = #tpu.dot_dimension_numbers<[1], [0], [0], [1], [0, 0, 1, 1], [], []>} : vector<20x8xf32>, vector<8x128xf32>, vector<20x128xf32> -> vector<20x128xf32>
    %c0_3 = arith.constant 0 : index
    %c0_4 = arith.constant 0 : index
    %3 = vector.load %arg3[%c0_3, %c0_4] : memref<20x1xf32, #tpu.memory_space<vmem>>, vector<20x1xf32>
    %4 = vector.broadcast %3 : vector<20x1xf32> to vector<20x128xf32>
    %5 = arith.addf %2, %4 : vector<20x128xf32>
    %cst_5 = arith.constant 0.00999999977 : f32
    %6 = vector.broadcast %cst_5 : f32 to vector<20x128xf32>
    %7 = arith.mulf %6, %5 : vector<20x128xf32>
    %8 = arith.maximumf %5, %7 : vector<20x128xf32>
    %c0_6 = arith.constant 0 : index
    %c0_7 = arith.constant 0 : index
    %9 = vector.load %arg4[%c0_6, %c0_7] : memref<100x20xf32, #tpu.memory_space<vmem>>, vector<100x20xf32>
    %cst_8 = arith.constant dense<0.000000e+00> : vector<100x128xf32>
    %10 = tpu.matmul %9, %8, %cst_8 {dimension_numbers = #tpu.dot_dimension_numbers<[1], [0], [0], [1], [0, 0, 1, 1], [], []>} : vector<100x20xf32>, vector<20x128xf32>, vector<100x128xf32> -> vector<100x128xf32>
    %c0_9 = arith.constant 0 : index
    %c0_10 = arith.constant 0 : index
    %11 = vector.load %arg5[%c0_9, %c0_10] : memref<100x1xf32, #tpu.memory_space<vmem>>, vector<100x1xf32>
    %12 = vector.broadcast %11 : vector<100x1xf32> to vector<100x128xf32>
    %13 = arith.addf %10, %12 : vector<100x128xf32>
    %cst_11 = arith.constant 0.00999999977 : f32
    %14 = vector.broadcast %cst_11 : f32 to vector<100x128xf32>
    %15 = arith.mulf %14, %13 : vector<100x128xf32>
    %16 = arith.maximumf %13, %15 : vector<100x128xf32>
    %c0_12 = arith.constant 0 : index
    %c0_13 = arith.constant 0 : index
    %17 = vector.load %arg6[%c0_12, %c0_13] : memref<1x100xf32, #tpu.memory_space<vmem>>, vector<1x100xf32>
    %cst_14 = arith.constant dense<0.000000e+00> : vector<1x128xf32>
    %18 = tpu.matmul %17, %16, %cst_14 {dimension_numbers = #tpu.dot_dimension_numbers<[1], [0], [0], [1], [0, 0, 1, 1], [], []>} : vector<1x100xf32>, vector<100x128xf32>, vector<1x128xf32> -> vector<1x128xf32>
    %c0_15 = arith.constant 0 : index
    %c0_16 = arith.constant 0 : index
    %19 = memref.load %arg7[%c0_15, %c0_16] : memref<1x1xf32, #tpu.memory_space<smem>>
    %20 = vector.broadcast %19 : f32 to vector<1x128xf32>
    %21 = arith.addf %18, %20 : vector<1x128xf32>
    %c0_17 = arith.constant 0 : index
    %c0_18 = arith.constant 0 : index
    %22 = vector.load %arg8[%c0_17, %c0_18] : memref<1x128xf32, #tpu.memory_space<vmem>>, vector<1x128xf32>
    tpu.vector_store %arg8[%c0_17, %c0_18], %21 {strides = array<i32>} : memref<1x128xf32, #tpu.memory_space<vmem>>, vector<1x128xf32>,
    return
  }
  func.func @transform_0(%arg0: i32) -> (i32, i32) {
    %c0_i32 = arith.constant 0 : i32
    %c0_i32_0 = arith.constant 0 : i32
    return %c0_i32, %arg0 : i32, i32
  }
  func.func @transform_1(%arg0: i32) -> (i32, i32) {
    %c0_i32 = arith.constant 0 : i32
    %c0_i32_0 = arith.constant 0 : i32
    %c0_i32_1 = arith.constant 0 : i32
    return %c0_i32, %c0_i32_0 : i32, i32
  }
  func.func @transform_2(%arg0: i32) -> (i32, i32) {
    %c0_i32 = arith.constant 0 : i32
    %c0_i32_0 = arith.constant 0 : i32
    %c0_i32_1 = arith.constant 0 : i32
    return %c0_i32, %c0_i32_0 : i32, i32
  }
  func.func @transform_3(%arg0: i32) -> (i32, i32) {
    %c0_i32 = arith.constant 0 : i32
    %c0_i32_0 = arith.constant 0 : i32
    %c0_i32_1 = arith.constant 0 : i32
    return %c0_i32, %c0_i32_0 : i32, i32
  }
  func.func @transform_4(%arg0: i32) -> (i32, i32) {
    %c0_i32 = arith.constant 0 : i32
    %c0_i32_0 = arith.constant 0 : i32
    %c0_i32_1 = arith.constant 0 : i32
    return %c0_i32, %c0_i32_0 : i32, i32
  }
  func.func @transform_5(%arg0: i32) -> (i32, i32) {
    %c0_i32 = arith.constant 0 : i32
    %c0_i32_0 = arith.constant 0 : i32
    %c0_i32_1 = arith.constant 0 : i32
    return %c0_i32, %c0_i32_0 : i32, i32
  }
  func.func @transform_6(%arg0: i32) -> (i32, i32) {
    %c0_i32 = arith.constant 0 : i32
    %c0_i32_0 = arith.constant 0 : i32
    %c0_i32_1 = arith.constant 0 : i32
    return %c0_i32, %c0_i32_0 : i32, i32
  }
  func.func @transform_7(%arg0: i32) -> (i32, i32) {
    %c0_i32 = arith.constant 0 : i32
    %c0_i32_0 = arith.constant 0 : i32
    return %c0_i32, %arg0 : i32, i32
  }
}

</mosaic_0001>

<bundles_post_ra>
// kernel: state_action_value_forward.1
= control target key start
LH: loop header
LB: loop body
LE: loop exit
PB: predicated region body
PF: predicated region fallthrough
CT: control target
= control target key end

     0   :  { %vm50_vm0 = vcmask 64512   ;;  %v722_v2 = vmov 0.0   ;;  %vm723_vm1 = vmmov 0   ;;  %v724_v4 = vmov 0   ;;  %s946_s0 = inlined_call_operand.vmem [shape: f32[8,8], index: 0, kind: input, shape index: {}]   ;;  %s947_s1 = inlined_call_operand.vmem [shape: f32[20,8], index: 1, kind: input, shape index: {}]   ;;  %s948_s2 = inlined_call_operand.vmem [shape: f32[20,1], index: 2, kind: input, shape index: {}]   ;;  %s949_s3 = inlined_call_operand.vmem [shape: f32[100,20], index: 3, kind: input, shape index: {}]   ;;  %s950_s4 = inlined_call_operand.vmem [shape: f32[100,1], index: 4, kind: input, shape index: {}]   ;;  %s951_s5 = inlined_call_operand.vmem [shape: f32[1,100], index: 5, kind: input, shape index: {}]   ;;  %s952_s6 = inlined_call_operand.<no memory space> [shape: f32[1,1], index: 6, kind: input, shape index: {}]   ;;  %s953_s7 = inlined_call_operand.hbm [shape: f32[1,8], index: 7, kind: output, shape index: {}]  }
   0x1   :  { %v28_v0 = vld [vmem:[%s946_s0] sm:$0xff]  ;;  %585 = vmatprep.subr.mxu0 %v722_v2  ;;  %587 = vmatprep.mubr.msk.f32.mxu0 %vm723_vm1, %v722_v2  ;;  %v34_v5 = vld [vmem:[%s948_s2 + $0x10] sm:$0xf]  ;;  %v30_v6 = vld [vmem:[%s947_s1 + $0x8] sm:$0xff] }
   0x2   :  { %v29_v1 = vld [vmem:[%s947_s1] sm:$0xff]  ;;  %586 = vmatpush3.msra.mxu0 %v28_v0  ;;  %696 = vset.pattern.permute.xlu0 %v724_v4  ;;  %v33_v7 = vld [vmem:[%s948_s2 + $0x8] sm:$0xff] }
   0x3   :  { %v32_v3 = vld [vmem:[%s948_s2] sm:$0xff]  ;;  %588 = vmatmul.mubr.msk.f32.vlgmr.msra.gmra.mrb[0].mxu0 %vm50_vm0, %v29_v1  ;;  %697 = vset.pattern.permute.xlu1 %v724_v4 }
   0x4   :  { %37 = vperm.xlu0 %696, %v32_v3   ;;  %590 = vmatprep.mubr.msk.f32.mxu0 %vm723_vm1, %v722_v2  ;;  %v159_v8 = vld [vmem:[%s950_s4] sm:$0xff] }
   0x5   :  { %47 = vperm.xlu1 %697, %v34_v5   ;;  %602 = vmatprep.mubr.msk.f32.mxu1 %vm723_vm1, %v722_v2 }
   0x6   :  { %13 = vsyncpa [#allocation4], 0  ;;  %v31_v9 = vld [vmem:[%s947_s1 + $0x10] sm:$0xf]  ;;  %v160_v10 = vld [vmem:[%s950_s4 + $0x8] sm:$0xff]  ;;  %v725_v22 = vmov 0.0|0.0  }
   0x7   :  { %591 = vmatmul.mubr.msk.f32.gmra.mrb[2].mxu0 %vm50_vm0, %v30_v6  ;;  %v161_v11 = vld [vmem:[%s950_s4 + $0x10] sm:$0xff]  ;;  %v162_v12 = vld [vmem:[%s950_s4 + $0x18] sm:$0xff]  ;;  %v163_v13 = vld [vmem:[%s950_s4 + $0x20] sm:$0xff]  ;;  %670 = vmatprep.subr.bf16.mxu1 %v725_v22  ;;  %vm277_vm2 = vcmask 1043456   ;;  %vm237_vm3 = vcmask 162816   ;;  %vm440_vm4 = vcmask 818176  }
   0x8   :  { %42 = vperm.xlu0 %696, %v33_v7   ;;  %593 = vmatprep.mubr.msk.f32.mxu0 %vm723_vm1, %v722_v2  ;;  %v164_v14 = vld [vmem:[%s950_s4 + $0x28] sm:$0xff]  ;;  %v165_v15 = vld [vmem:[%s950_s4 + $0x30] sm:$0xff]  ;;  %v166_v16 = vld [vmem:[%s950_s4 + $0x38] sm:$0xff]  ;;  %s726_s15 = smov [#allocation3]  }
   0x9   :  { %174 = vperm.xlu1 %697, %v159_v8   ;;  %v167_v17 = vld [vmem:[%s950_s4 + $0x40] sm:$0xff]  ;;  %v168_v18 = vld [vmem:[%s950_s4 + $0x48] sm:$0xff]  ;;  %v169_v19 = vld [vmem:[%s950_s4 + $0x50] sm:$0xff]  ;;  %673 = vmatprep.subr.bf16.mxu0 %v725_v22  ;;  %s524_s2 = sshll.u32 %s726_s15, 4  ;;  %s525_s2 = int_to_ptr.vmem [resolvable:$true] %s524_s2 }
   0xa   :  { %v170_v20 = vld [vmem:[%s950_s4 + $0x58] sm:$0xff]  ;;  %v171_v21 = vld [vmem:[%s950_s4 + $0x60] sm:$0xf]  ;;  %v147_v43 = vld [vmem:[%s949_s3 + $0x8] sm:$0xff]  ;;  %s698_s16 = scalar_lea.vmem %s525_s2, 16  ;;  %s702_s17 = scalar_lea.vmem %s525_s2, 32 }
   0xb   :  { %594 = vmatmul.mubr.msk.f32.gmra.mrb[4].mxu0 %vm50_vm0, %v31_v9  ;;  %v146_v42 = vld [vmem:[%s949_s3] sm:$0xff]  ;;  %v148_v44 = vld [vmem:[%s949_s3 + $0x10] sm:$0xff]  ;;  %v149_v45 = vld [vmem:[%s949_s3 + $0x18] sm:$0xff]  ;;  %p699_p0 = scmp.ne.s32.totalorder %s525_s2, %s698_s16  ;;  %p703_p1 = scmp.lt.s32.totalorder %s525_s2, %s525_s2 }
   0xc   :  { %179 = vperm.xlu0 %696, %v160_v10   ;;  %667 = vmatprep.mubr.msk.f32.mxu0 %vm723_vm1, %v722_v2  ;;  %v150_v46 = vld [vmem:[%s949_s3 + $0x20] sm:$0xff]  ;;  %v151_v47 = vld [vmem:[%s949_s3 + $0x28] sm:$0xff]  ;;  %v152_v48 = vld [vmem:[%s949_s3 + $0x30] sm:$0xff]  ;;  %p704_p2 = scmp.lt.s32.totalorder %s702_s17, %s698_s16 }
   0xd   :  { %184 = vperm.xlu1 %697, %v161_v11   ;;  %v153_v49 = vld [vmem:[%s949_s3 + $0x38] sm:$0xff]  ;;  %v154_v50 = vld [vmem:[%s949_s3 + $0x40] sm:$0xff]  ;;  %v155_v51 = vld [vmem:[%s949_s3 + $0x48] sm:$0xff] }
   0xe   :  { %v156_v52 = vld [vmem:[%s949_s3 + $0x50] sm:$0xff]  ;;  %v157_v53 = vld [vmem:[%s949_s3 + $0x58] sm:$0xff]  ;;  %v158_v54 = vld [vmem:[%s949_s3 + $0x60] sm:$0xf]  ;;  %p705_p3 = por %p704_p2, %p703_p1 }
  0x10   :  { %189 = vperm.xlu0 %696, %v162_v12   ;;  %p706_p4 = pnand %p705_p3, %p699_p0 }
  0x11   :  { %194 = vperm.xlu1 %697, %v163_v13  }
  0x14   :  { %199 = vperm.xlu0 %696, %v164_v14  }
  0x15   :  { %204 = vperm.xlu1 %697, %v165_v15  }
  0x18   :  { %209 = vperm.xlu0 %696, %v166_v16  }
  0x19   :  { %214 = vperm.xlu1 %697, %v167_v17  }
  0x1c   :  { %219 = vperm.xlu0 %696, %v168_v18  }
  0x1d   :  { %224 = vperm.xlu1 %697, %v169_v19  }
  0x20   :  { %229 = vperm.xlu0 %696, %v170_v20  }
  0x21   :  { %234 = vperm.xlu1 %697, %v171_v21  }
  0x83   :  { %v38_v23 = vpop.permute.xlu0 %37 }
  0x84   :  { %v48_v33 = vpop.permute.xlu1 %47 }
  0x87   :  { %v43_v27 = vpop.permute.xlu0 %42 }
  0x88   :  { %v175_v55 = vpop.permute.xlu1 %174 }
  0x8b   :  { %v180_v59 = vpop.permute.xlu0 %179 }
  0x8c   :  { %v185_v1 = vpop.permute.xlu1 %184 }
  0x8f   :  { %v190_v9 = vpop.permute.xlu0 %189 }
  0x90   :  { %v195_v15 = vpop.permute.xlu1 %194 }
  0xd6   :  { %v126_v24 = vpop.f32.mrb[0].mxu0 }
  0xd7   :  { %v127_v25 = vadd.f32 %v126_v24, %v38_v23  ;;  %v589_v26 = vpop.f32.mrb[1].mxu0  ;;  %v200_v23 = vpop.permute.xlu0 %199 }
  0xd9   :  { %v140_v29 = vmul.f32 0.01, %v127_v25 }
  0xda   :  { %v131_v28 = vpop.f32.mrb[2].mxu0 }
  0xdb   :  { %v132_v30 = vadd.f32 %v131_v28, %v43_v27  ;;  %v592_v31 = vpop.f32.mrb[3].mxu0  ;;  %v143_v35 = vmax.f32 %v127_v25, %v140_v29  ;;  %v205_v29 = vpop.permute.xlu1 %204 }
  0xdd   :  { %v141_v32 = vmul.f32 0.01, %v132_v30 }
  0xde   :  { %v136_v34 = vpop.f32.mrb[4].mxu0 }
  0xdf   :  { %v144_v36 = vmax.f32 %v132_v30, %v141_v32  ;;  %v137_v37 = vadd.f32 %v136_v34, %v48_v33  ;;  %v595_v38 = vpop.f32.mrb[5].mxu0 }
  0xe1   :  { %v142_v39 = vmul.f32 0.01, %v137_v37  ;;  %v671_v40 = vpack.c.bf16 %v144_v36, %v143_v35  ;;  %v210_v36 = vpop.permute.xlu0 %209 }
  0xe3   :  { %672 = vmatpush3.bf16.msra.mxu1 %v671_v40  ;;  %v145_v41 = vmax.f32 %v137_v37, %v142_v39 }
  0xe4   :  { %600 = vmatprep.subr.mxu1 %v722_v2 }
  0xe7   :  { %601 = vmatpush3.msk.msra.mxu1 %vm277_vm2, %v145_v41 }
  0xe8   :  { %603 = vmatmul.mubr.msk.f32.vlgmr.msra.gmra.mrb[0].mxu1 %vm237_vm3, %v146_v42  ;;  %v215_v42 = vpop.permute.xlu1 %214 }
  0xe9   :  { %605 = vmatprep.mubr.msk.f32.mxu1 %vm723_vm1, %v722_v2 }
  0xec   :  { %606 = vmatmul.mubr.msk.f32.gmra.mrb[2].mxu1 %vm237_vm3, %v147_v43 }
  0xed   :  { %608 = vmatprep.mubr.msk.f32.mxu1 %vm723_vm1, %v722_v2 }
  0xf0   :  { %609 = vmatmul.mubr.msk.f32.gmra.mrb[4].mxu1 %vm237_vm3, %v148_v44 }
  0xf1   :  { %611 = vmatprep.mubr.msk.f32.mxu1 %vm723_vm1, %v722_v2 }
  0xf4   :  { %612 = vmatmul.mubr.msk.f32.gmra.mrb[6].mxu1 %vm237_vm3, %v149_v45 }
  0xf5   :  { %614 = vmatprep.mubr.msk.f32.mxu1 %vm723_vm1, %v722_v2 }
  0xf8   :  { %615 = vmatmul.mubr.msk.f32.gmra.mrb[8].mxu1 %vm237_vm3, %v150_v46 }
  0xf9   :  { %617 = vmatprep.mubr.msk.f32.mxu1 %vm723_vm1, %v722_v2 }
  0xfc   :  { %618 = vmatmul.mubr.msk.f32.gmra.mrb[10].mxu1 %vm237_vm3, %v151_v47 }
  0xfd   :  { %620 = vmatprep.mubr.msk.f32.mxu1 %vm723_vm1, %v722_v2 }
 0x100   :  { %621 = vmatmul.mubr.msk.f32.gmra.mrb[12].mxu1 %vm237_vm3, %v152_v48 }
 0x101   :  { %623 = vmatprep.mubr.msk.f32.mxu1 %vm723_vm1, %v722_v2 }
 0x104   :  { %624 = vmatmul.mubr.msk.f32.gmra.mrb[14].mxu1 %vm237_vm3, %v153_v49  ;;  %v220_v49 = vpop.permute.xlu0 %219 }
 0x105   :  { %626 = vmatprep.mubr.msk.f32.mxu1 %vm723_vm1, %v722_v2 }
 0x108   :  { %627 = vmatmul.mubr.msk.f32.gmra.mrb[16].mxu1 %vm237_vm3, %v154_v50 }
 0x109   :  { %629 = vmatprep.mubr.msk.f32.mxu1 %vm723_vm1, %v722_v2 }
 0x10c   :  { %630 = vmatmul.mubr.msk.f32.gmra.mrb[18].mxu1 %vm237_vm3, %v155_v51 }
 0x10d   :  { %632 = vmatprep.mubr.msk.f32.mxu1 %vm723_vm1, %v722_v2 }
 0x110   :  { %633 = vmatmul.mubr.msk.f32.gmra.mrb[20].mxu1 %vm237_vm3, %v156_v52 }
 0x111   :  { %635 = vmatprep.mubr.msk.f32.mxu1 %vm723_vm1, %v722_v2 }
 0x114   :  { %636 = vmatmul.mubr.msk.f32.gmra.mrb[22].mxu1 %vm237_vm3, %v157_v53 }
 0x115   :  { %638 = vmatprep.mubr.msk.f32.mxu1 %vm723_vm1, %v722_v2 }
 0x118   :  { %639 = vmatmul.mubr.msk.f32.gmra.mrb[24].mxu1 %vm237_vm3, %v158_v54 }
 0x1bb   :  { %v347_v56 = vpop.f32.mrb[0].mxu1 }
 0x1bc   :  { %v348_v57 = vadd.f32 %v347_v56, %v175_v55  ;;  %v604_v58 = vpop.f32.mrb[1].mxu1  ;;  %v225_v55 = vpop.permute.xlu1 %224 }
 0x1be   :  { %v411_v61 = vmul.f32 0.01, %v348_v57 }
 0x1bf   :  { %v352_v60 = vpop.f32.mrb[2].mxu1 }
 0x1c0   :  { %v353_v62 = vadd.f32 %v352_v60, %v180_v59  ;;  %v607_v63 = vpop.f32.mrb[3].mxu1  ;;  %v424_v4 = vmax.f32 %v348_v57, %v411_v61 }
 0x1c2   :  { %v412_v0 = vmul.f32 0.01, %v353_v62 }
 0x1c3   :  { %v357_v3 = vpop.f32.mrb[4].mxu1 }
 0x1c4   :  { %v425_v5 = vmax.f32 %v353_v62, %v412_v0  ;;  %v358_v6 = vadd.f32 %v357_v3, %v185_v1  ;;  %v610_v7 = vpop.f32.mrb[5].mxu1  ;;  %v230_v62 = vpop.permute.xlu0 %229 }
 0x1c6   :  { %v674_v8 = vpack.c.bf16 %v425_v5, %v424_v4  ;;  %v413_v11 = vmul.f32 0.01, %v358_v6  ;;  %v235_v5 = vpop.permute.xlu1 %234 }
 0x1c7   :  { %v362_v10 = vpop.f32.mrb[6].mxu1 }
 0x1c8   :  { %v363_v12 = vadd.f32 %v362_v10, %v190_v9  ;;  %v613_v13 = vpop.f32.mrb[7].mxu1  ;;  %675 = vmatpush3.bf16.msra.mxu0 %v674_v8  ;;  %v426_v17 = vmax.f32 %v358_v6, %v413_v11 }
 0x1c9   :  { %676 = vmatprep.subr.bf16.mxu0 %v725_v22 }
 0x1ca   :  { %v414_v14 = vmul.f32 0.01, %v363_v12 }
 0x1cb   :  { %v367_v16 = vpop.f32.mrb[8].mxu1 }
 0x1cc   :  { %v427_v18 = vmax.f32 %v363_v12, %v414_v14  ;;  %v368_v19 = vadd.f32 %v367_v16, %v195_v15  ;;  %v616_v20 = vpop.f32.mrb[9].mxu1  ;;  %v437_v14 = vld [vmem:[%s951_s5] sm:$0x1] }
 0x1ce   :  { %v677_v21 = vpack.c.bf16 %v427_v18, %v426_v17  ;;  %v415_v25 = vmul.f32 0.01, %v368_v19 }
 0x1cf   :  { %v372_v24 = vpop.f32.mrb[10].mxu1 }
 0x1d0   :  { %v373_v26 = vadd.f32 %v372_v24, %v200_v23  ;;  %v619_v27 = vpop.f32.mrb[11].mxu1  ;;  %678 = vmatpush3.bf16.msra.mxu0 %v677_v21  ;;  %v428_v31 = vmax.f32 %v368_v19, %v415_v25 }
 0x1d1   :  { %679 = vmatprep.subr.bf16.mxu0 %v725_v22 }
 0x1d2   :  { %v416_v28 = vmul.f32 0.01, %v373_v26 }
 0x1d3   :  { %v377_v30 = vpop.f32.mrb[12].mxu1 }
 0x1d4   :  { %v429_v32 = vmax.f32 %v373_v26, %v416_v28  ;;  %v378_v33 = vadd.f32 %v377_v30, %v205_v29  ;;  %v622_v34 = vpop.f32.mrb[13].mxu1 }
 0x1d6   :  { %v680_v35 = vpack.c.bf16 %v429_v32, %v428_v31  ;;  %v417_v38 = vmul.f32 0.01, %v378_v33 }
 0x1d7   :  { %v382_v37 = vpop.f32.mrb[14].mxu1 }
 0x1d8   :  { %v383_v39 = vadd.f32 %v382_v37, %v210_v36  ;;  %v625_v40 = vpop.f32.mrb[15].mxu1  ;;  %681 = vmatpush3.bf16.msra.mxu0 %v680_v35  ;;  %v430_v44 = vmax.f32 %v378_v33, %v417_v38 }
 0x1d9   :  { %682 = vmatprep.subr.bf16.mxu0 %v725_v22 }
 0x1da   :  { %v418_v41 = vmul.f32 0.01, %v383_v39 }
 0x1db   :  { %v387_v43 = vpop.f32.mrb[16].mxu1 }
 0x1dc   :  { %v431_v45 = vmax.f32 %v383_v39, %v418_v41  ;;  %v388_v46 = vadd.f32 %v387_v43, %v215_v42  ;;  %v628_v47 = vpop.f32.mrb[17].mxu1 }
 0x1de   :  { %v683_v48 = vpack.c.bf16 %v431_v45, %v430_v44  ;;  %v419_v51 = vmul.f32 0.01, %v388_v46 }
 0x1df   :  { %v392_v50 = vpop.f32.mrb[18].mxu1 }
 0x1e0   :  { %v393_v52 = vadd.f32 %v392_v50, %v220_v49  ;;  %v631_v53 = vpop.f32.mrb[19].mxu1  ;;  %684 = vmatpush3.bf16.msra.mxu0 %v683_v48  ;;  %v432_v57 = vmax.f32 %v388_v46, %v419_v51 }
 0x1e1   :  { %685 = vmatprep.subr.bf16.mxu0 %v725_v22 }
 0x1e2   :  { %v420_v54 = vmul.f32 0.01, %v393_v52 }
 0x1e3   :  { %v397_v56 = vpop.f32.mrb[20].mxu1 }
 0x1e4   :  { %v433_v58 = vmax.f32 %v393_v52, %v420_v54  ;;  %v398_v59 = vadd.f32 %v397_v56, %v225_v55  ;;  %v634_v60 = vpop.f32.mrb[21].mxu1 }
 0x1e6   :  { %v686_v61 = vpack.c.bf16 %v433_v58, %v432_v57  ;;  %v421_v0 = vmul.f32 0.01, %v398_v59 }
 0x1e7   :  { %v402_v63 = vpop.f32.mrb[22].mxu1 }
 0x1e8   :  { %v403_v1 = vadd.f32 %v402_v63, %v230_v62  ;;  %v637_v3 = vpop.f32.mrb[23].mxu1  ;;  %687 = vmatpush3.bf16.msra.mxu0 %v686_v61  ;;  %v434_v7 = vmax.f32 %v398_v59, %v421_v0 }
 0x1e9   :  { %688 = vmatprep.subr.bf16.mxu0 %v725_v22  ;;  %v439_v22 = vstv %s952_s6 }
 0x1ea   :  { %v422_v4 = vmul.f32 0.01, %v403_v1 }
 0x1eb   :  { %v407_v6 = vpop.f32.mrb[24].mxu1 }
 0x1ec   :  { %v435_v8 = vmax.f32 %v403_v1, %v422_v4  ;;  %v408_v9 = vadd.f32 %v407_v6, %v235_v5  ;;  %v640_v10 = vpop.f32.mrb[25].mxu1 }
 0x1ee   :  { %v689_v11 = vpack.c.bf16 %v435_v8, %v434_v7  ;;  %v423_v12 = vmul.f32 0.01, %v408_v9 }
 0x1f0   :  { %690 = vmatpush3.bf16.msra.mxu0 %v689_v11  ;;  %v436_v13 = vmax.f32 %v408_v9, %v423_v12 }
 0x1f1   :  { %665 = vmatprep.subr.mxu0 %v722_v2 }
 0x1f4   :  { %666 = vmatpush3.msk.msra.mxu0 %vm277_vm2, %v436_v13 }
 0x1f5   :  { %668 = vmatmul.mubr.msk.f32.vlgmr.msra.gmra.mrb[6].mxu0 %vm440_vm4, %v437_v14 }
 0x2c8   :  { %v513_v15 = vpop.f32.mrb[6].mxu0 }
 0x2c9   :  { %v514_v16 = vadd.f32 %v513_v15, %v439_v22  ;;  %v669_v17 = vpop.f32.mrb[7].mxu0 }
 0x2cb   :  { %517 = vst [vmem:[#allocation3] sm:$0x1] %v514_v16 }
 0x2cc   :  { %709 = shalt.err (!%p706_p4)
}
 0x2cd   :  { %s710_s19 = scalar_lea.hbm %s953_s7, 16 }
 0x2ce   :  { %p711_p5 = scmp.ne.s32.totalorder %s953_s7, %s710_s19  ;;  %p714_p6 = scmp.lt.u32.totalorder %s710_s19, %s953_s7 }
 0x2d0   :  { %p716_p7 = pnand %p714_p6, %p711_p5 }
 0x2d2   :  { %719 = shalt.err (!%p716_p7)
}
 0x2d3   :  { %527 = dma.vmem_to_hbm [thread:$0]  %s525_s2, 16, %s953_s7, [#allocation4]  }
 0x2d4   :  { %720 = dma.done.wait [#allocation4], 16  }
 0x2d5   :  { %721 = vsyncadd [#allocation4], 4294967280 }
 0x2d6   :  { %531 = vsyncpa [#allocation4], 1 }

</bundles_post_ra>
